<compile_context>
chip_gen: v7x
topology: tpu7x:2x2x1
jax: 0.10.0
libtpu: 0.0.40
codegen_flags: <defaults>
</compile_context>

<pallas_src>
import jax
import jax.numpy as jnp
from jax.experimental import pallas as pl
from jax.experimental.pallas import tpu as pltpu

KNN_NUM = 8          # neighbours per point (KNN_num in the PyTorch module)
PACK = 4             # points packed side-by-side along the lane dimension


def _pc_conv_first_kernel(x_ref, w1_ref, w2_ref, b2_ref, o_ref):
    # x_ref : (block_rows, 4*PACK)   packed homogeneous coords (4 points per row)
    # w1_ref: (4*PACK, PACK*ef)      block-diag([w1; b1] x PACK)  (bias folded in)
    # w2_ref: (PACK*ef, PACK*ef)     block-diag(w2 x PACK)
    # b2_ref: (1, PACK*ef)           tile(b2, PACK)
    # o_ref : (block_rows // KNN_NUM, PACK*ef)
    h = jnp.dot(x_ref[...], w1_ref[...], preferred_element_type=jnp.float32)
    h = jnp.maximum(h, 0.01 * h)                             # leaky_relu(0.01), exact
    y = jnp.dot(h, w2_ref[...], preferred_element_type=jnp.float32)
    # Rows of one point-group are contiguous and KNN_NUM == 8 == sublanes, so the
    # reshape is a free view and the max is a single sublane reduce per vreg (XLU).
    g = o_ref.shape[0]
    y = y.reshape(g, KNN_NUM, y.shape[-1])
    o_ref[...] = jnp.max(y, axis=1) + b2_ref[...]            # fold b2 after the max


def _round_up(x, m):
    return (x + m - 1) // m * m


def pc_conv_first(knn_xyz, w1, b1, w2, b2, *, groups_per_block=1024):
    """Forward pass of pc_conv_first.

    knn_xyz : (N*KNN_NUM, 3) f32; rows of point p occupy [p*KNN_NUM, (p+1)*KNN_NUM).
    w1: (3, ef), b1: (ef,)/(1, ef), w2: (ef, ef), b2: (ef,)/(1, ef)   ([in, out] layout).
    groups_per_block=1024 -> 4096 points (= 32768 original rows) per grid step;
    it is clamped for small inputs. Returns (N, ef) f32.
    """
    M, three = knn_xyz.shape
    assert three == 3 and M % KNN_NUM == 0
    n_points = M // KNN_NUM
    ef = w1.shape[1]
    lanes = PACK * ef

    b1 = b1.reshape(1, ef)
    b2 = b2.reshape(1, ef)

    # ---- wrapper-side layout plumbing (pure pad/reshape/transpose, done by XLA) ----
    n_groups = pl.cdiv(n_points, PACK)
    # Clamp the tile for tiny inputs; keep it a multiple of 8 so the output block's
    # sublane dim stays aligned when the grid has more than one step.
    gpb = max(8, min(groups_per_block, _round_up(n_groups, 8)))
    n_groups_pad = _round_up(n_groups, gpb)
    n_points_pad = n_groups_pad * PACK

    x = knn_xyz.reshape(n_points, KNN_NUM, 3)
    # Homogeneous coordinate: append a constant-1 lane so b1 rides the MXU for free.
    x = jnp.pad(x, ((0, 0), (0, 0), (0, 1)), constant_values=1.0)       # (N, 8, 4)
    x = jnp.pad(x, ((0, n_points_pad - n_points), (0, 0), (0, 0)))
    # (groups, PACK, KNN, 4) -> (groups, KNN, PACK, 4) -> (groups*KNN, PACK*4)
    x = x.reshape(n_groups_pad, PACK, KNN_NUM, 4).transpose(0, 2, 1, 3)
    x = x.reshape(n_groups_pad * KNN_NUM, PACK * 4)

    # Block-diagonal packed weights / lane-tiled bias (lane-dense: 4*ef = 128).
    w1b = jnp.concatenate([w1, b1], axis=0)                   # (4, ef)  bias folded
    w1p = jax.scipy.linalg.block_diag(*([w1b] * PACK))        # (16, lanes)
    w2p = jax.scipy.linalg.block_diag(*([w2] * PACK))         # (lanes, lanes)
    b2p = jnp.tile(b2, (1, PACK))                             # (1, lanes)

    block_rows = gpb * KNN_NUM
    grid = (n_groups_pad // gpb,)

    out_packed = pl.pallas_call(
        _pc_conv_first_kernel,
        out_shape=jax.ShapeDtypeStruct((n_groups_pad, lanes), jnp.float32),
        grid_spec=pl.GridSpec(
            grid=grid,
            in_specs=[
                pl.BlockSpec((block_rows, PACK * 4), lambda i: (i, 0)),
                pl.BlockSpec((PACK * 4, lanes), lambda i: (0, 0)),
                pl.BlockSpec((lanes, lanes), lambda i: (0, 0)),
                pl.BlockSpec((1, lanes), lambda i: (0, 0)),
            ],
            out_specs=pl.BlockSpec((gpb, lanes), lambda i: (i, 0)),
        ),
        compiler_params=pltpu.CompilerParams(
            dimension_semantics=("parallel",),   # shards the grid across TCs (v7x)
        ),
    )(x, w1p, w2p, b2p)

    # (n_groups_pad, 4*ef) is a row-major view of (n_points_pad, ef); drop padding.
    return out_packed.reshape(n_points_pad, ef)[:n_points]


def _reference(knn_xyz, w1, b1, w2, b2):
    h = knn_xyz @ w1 + b1.reshape(1, -1)
    h = jnp.maximum(h, 0.01 * h)
    y = h @ w2 + b2.reshape(1, -1)
    return jnp.max(y.reshape(-1, KNN_NUM, w2.shape[1]), axis=1)


if __name__ == "__main__":
    ef_dim = 32
    n_points = 50                       # not a multiple of PACK -> exercises padding
    M = n_points * KNN_NUM              # 400 rows of (x, y, z)

    key = jax.random.PRNGKey(0)
    k_x, k_w1, k_b1, k_w2, k_b2 = jax.random.split(key, 5)

    knn_xyz = jax.random.normal(k_x, (M, 3), dtype=jnp.float32)
    # Deterministic params (shapes of nn.Linear(3, ef) / nn.Linear(ef, ef)),
    # stored transposed ([in, out]) for row-major matmuls.
    w1 = jax.random.uniform(k_w1, (3, ef_dim), jnp.float32, -0.5, 0.5)
    b1 = jax.random.uniform(k_b1, (1, ef_dim), jnp.float32, -0.5, 0.5)
    w2 = jax.random.uniform(k_w2, (ef_dim, ef_dim), jnp.float32, -0.1, 0.1)
    b2 = jax.random.uniform(k_b2, (1, ef_dim), jnp.float32, -0.1, 0.1)

    # Small tile -> multi-step grid (exercises pipelining + ragged padding path).
    out_small = jax.block_until_ready(
        pc_conv_first(knn_xyz, w1, b1, w2, b2, groups_per_block=8))
    # Default (large) tile -> single step for this tiny input.
    out_default = jax.block_until_ready(pc_conv_first(knn_xyz, w1, b1, w2, b2))

    ref = _reference(knn_xyz, w1, b1, w2, b2)
    assert out_small.shape == (n_points, ef_dim)
    assert out_default.shape == (n_points, ef_dim)
    assert jnp.allclose(out_small, ref, atol=1e-4, rtol=1e-4)
    assert jnp.allclose(out_default, ref, atol=1e-4, rtol=1e-4)

    print("KERNEL_OK")
</pallas_src>

<mosaic_0001>
module attributes {stable_mosaic.version = 11 : i64} {
  func.func @_pc_conv_first_kernel(%arg0: i32, %arg1: memref<64x16xf32, #tpu.memory_space<vmem>>, %arg2: memref<16x128xf32, #tpu.memory_space<vmem>>, %arg3: memref<128x128xf32, #tpu.memory_space<vmem>>, %arg4: memref<1x128xf32, #tpu.memory_space<vmem>>, %arg5: memref<8x128xf32, #tpu.memory_space<vmem>>) attributes {dimension_semantics = [#tpu.dimension_semantics<parallel>], iteration_bounds = array<i64: 2>, scalar_prefetch = 0 : i64, scratch_operands = 0 : i64, tpu.core_type = #tpu.core_type<tc>, window_params = [{transform_indices = @transform_0, window_bounds = array<i64: 64, 16>}, {pipeline_mode = #tpu.pipeline_mode<synchronous>, transform_indices = @transform_1, window_bounds = array<i64: 16, 128>}, {pipeline_mode = #tpu.pipeline_mode<synchronous>, transform_indices = @transform_2, window_bounds = array<i64: 128, 128>}, {pipeline_mode = #tpu.pipeline_mode<synchronous>, transform_indices = @transform_3, window_bounds = array<i64: 1, 128>}, {transform_indices = @transform_4, window_bounds = array<i64: 8, 128>}]} {
    %c0 = arith.constant 0 : index
    %c0_0 = arith.constant 0 : index
    %0 = vector.load %arg1[%c0, %c0_0] : memref<64x16xf32, #tpu.memory_space<vmem>>, vector<64x16xf32>
    %c0_1 = arith.constant 0 : index
    %c0_2 = arith.constant 0 : index
    %1 = vector.load %arg2[%c0_1, %c0_2] : memref<16x128xf32, #tpu.memory_space<vmem>>, vector<16x128xf32>
    %cst = arith.constant dense<0.000000e+00> : vector<64x128xf32>
    %2 = tpu.matmul %0, %1, %cst {dimension_numbers = #tpu.dot_dimension_numbers<[1], [0], [0], [1], [0, 0, 1, 1], [], []>} : vector<64x16xf32>, vector<16x128xf32>, vector<64x128xf32> -> vector<64x128xf32>
    %cst_3 = arith.constant 0.00999999977 : f32
    %3 = vector.broadcast %cst_3 : f32 to vector<64x128xf32>
    %4 = arith.mulf %3, %2 : vector<64x128xf32>
    %5 = arith.maximumf %2, %4 : vector<64x128xf32>
    %c0_4 = arith.constant 0 : index
    %c0_5 = arith.constant 0 : index
    %6 = vector.load %arg3[%c0_4, %c0_5] : memref<128x128xf32, #tpu.memory_space<vmem>>, vector<128x128xf32>
    %cst_6 = arith.constant dense<0.000000e+00> : vector<64x128xf32>
    %7 = tpu.matmul %5, %6, %cst_6 {dimension_numbers = #tpu.dot_dimension_numbers<[1], [0], [0], [1], [0, 0, 1, 1], [], []>} : vector<64x128xf32>, vector<128x128xf32>, vector<64x128xf32> -> vector<64x128xf32>
    %8 = vector.shape_cast %7 : vector<64x128xf32> to vector<8x8x128xf32>
    %cst_7 = arith.constant dense<0xFF800000> : vector<8x128xf32>
    %9 = vector.multi_reduction <maximumf>, %8, %cst_7 [1] : vector<8x8x128xf32> to vector<8x128xf32>
    %c0_8 = arith.constant 0 : index
    %c0_9 = arith.constant 0 : index
    %10 = vector.load %arg4[%c0_8, %c0_9] : memref<1x128xf32, #tpu.memory_space<vmem>>, vector<1x128xf32>
    %11 = vector.broadcast %10 : vector<1x128xf32> to vector<8x128xf32>
    %12 = arith.addf %9, %11 : vector<8x128xf32>
    %c0_10 = arith.constant 0 : index
    %c0_11 = arith.constant 0 : index
    %13 = vector.load %arg5[%c0_10, %c0_11] : memref<8x128xf32, #tpu.memory_space<vmem>>, vector<8x128xf32>
    tpu.vector_store %arg5[%c0_10, %c0_11], %12 {strides = array<i32>} : memref<8x128xf32, #tpu.memory_space<vmem>>, vector<8x128xf32>,
    return
  }
  func.func @transform_0(%arg0: i32) -> (i32, i32) {
    %c0_i32 = arith.constant 0 : i32
    %c0_i32_0 = arith.constant 0 : i32
    return %arg0, %c0_i32 : i32, i32
  }
  func.func @transform_1(%arg0: i32) -> (i32, i32) {
    %c0_i32 = arith.constant 0 : i32
    %c0_i32_0 = arith.constant 0 : i32
    %c0_i32_1 = arith.constant 0 : i32
    return %c0_i32, %c0_i32_0 : i32, i32
  }
  func.func @transform_2(%arg0: i32) -> (i32, i32) {
    %c0_i32 = arith.constant 0 : i32
    %c0_i32_0 = arith.constant 0 : i32
    %c0_i32_1 = arith.constant 0 : i32
    return %c0_i32, %c0_i32_0 : i32, i32
  }
  func.func @transform_3(%arg0: i32) -> (i32, i32) {
    %c0_i32 = arith.constant 0 : i32
    %c0_i32_0 = arith.constant 0 : i32
    %c0_i32_1 = arith.constant 0 : i32
    return %c0_i32, %c0_i32_0 : i32, i32
  }
  func.func @transform_4(%arg0: i32) -> (i32, i32) {
    %c0_i32 = arith.constant 0 : i32
    %c0_i32_0 = arith.constant 0 : i32
    return %arg0, %c0_i32 : i32, i32
  }
}

</mosaic_0001>

<bundles_post_ra>
// kernel: tpu_custom_call.1
= control target key start
LH: loop header
LB: loop body
LE: loop exit
PB: predicated region body
PF: predicated region fallthrough
CT: control target
= control target key end

     0   :  { %9 = vsyncpa [#allocation3], 0  ;;  %s1116_s0 = inlined_call_operand.vmem [shape: f32[128,16], index: 0, kind: input, shape index: {}]   ;;  %s1117_s1 = inlined_call_operand.vmem [shape: f32[16,128], index: 1, kind: input, shape index: {}]   ;;  %s1118_s2 = inlined_call_operand.vmem [shape: f32[128,128], index: 2, kind: input, shape index: {}]   ;;  %s1119_s3 = inlined_call_operand.vmem [shape: f32[1,128], index: 3, kind: input, shape index: {}]   ;;  %s1120_s4 = inlined_call_operand.hbm [shape: f32[16,128], index: 4, kind: output, shape index: {}]  }
   0x1   :  { %11 = vsyncpa [#allocation3 + $0x1], 0  ;;  %s937_s15 = smov 0   ;;  %s939_s16 = smov 0  }
   0x2   :  { %s941_s17 = smov 0   ;;  %s943_s18 = smov 0  }
   0x3 LB: > { %s958_s19 = sadd.s32 4294967295, %s909_s18   ;;  %s642_s20 = sadd.s32 4294967294, %s909_s18   ;;  %s909_s18 = sphi %s943_s18, %s1126_s18   ;;  %s905_s17 = sphi %s941_s17, %s1125_s17   ;;  %s901_s16 = sphi %s939_s16, %s1124_s16   ;;  %s897_s15 = sphi %s937_s15, %s1123_s15  }
   0x4   : > { %s962_s21 = sadd.s32 1, %s909_s18   ;;  %s113_s22 = sadd.s32 1, %s905_s17 }
   0x5   : > { %s110_s23 = ssub.s32 %s909_s18, %s962_s21  ;;  %p123_p0 = scmp.ne.s32.totalorder %s905_s17, %s901_s16 }
   0x6   : > { %p111_p1 = scmp.eq.s32.totalorder %s110_s23, 0  ;;  %p124_p2 = scmp.eq.s32.totalorder %s958_s19, 1 }
   0x7   : > { %p129_p3 = scmp.ne.s32.totalorder %s901_s16, %s897_s15  ;;  %p130_p4 = scmp.eq.s32.totalorder %s642_s20, 1 }
   0x8   : > { %s973_s24 = scalar_select %p111_p1, %s905_s17, %s113_s22  }
   0x9   : > { %p975_p5 = por %p124_p2, %p123_p0  ;;  %p979_p6 = por %p130_p4, %p129_p3 }
   0xa   : > { %p645_p7 = scmp.ge.s32.totalorder %s909_s18, 1  ;;  %p166_p8 = scmp.lt.s32.totalorder %s909_s18, 3 }
   0xc   : > { %p167_p9 = pnand %p645_p7, %p166_p8 }
   0xd   : > { %v206_v0 = vld [vmem:[%s1117_s1] sm:$0xff] (!%p167_p9)  ;;  %v207_v1 = vld [vmem:[%s1117_s1 + $0x8] sm:$0xff] (!%p167_p9)  ;;  %s647_s5 = sshll.u32 (!%p167_p9), %s958_s19, 3  ;;  %v356_v5 = vld [vmem:[%s1118_s2 + $0x10] sm:$0xff] (!%p167_p9)  ;;  %vm208_vm0 = vcmask (!%p167_p9), 130048   ;;  %vm547_vm1 = vcmask (!%p167_p9), 1041409  }
   0xe   : > { %170 = sbr.rel (%p167_p9) target bundleno = 501 (0x1f5), region = 36  ;;  %v354_v2 = vld [vmem:[%s1118_s2] sm:$0xff] (!%p167_p9)  ;;  %v756_v3 = vpack.c.bf16 (!%p167_p9), %v207_v1, %v206_v0  ;;  %p193_p10 = scmp.lt.s32.totalorder (!%p167_p9), %s647_s5, 15  ;;  %v355_v4 = vld [vmem:[%s1118_s2 + $0x8] sm:$0xff] (!%p167_p9)  ;;  %v357_v6 = vld [vmem:[%s1118_s2 + $0x18] sm:$0xff] (!%p167_p9)  ;;  %vm550_vm2 = vcmask (!%p167_p9), 1042434  }
   0xf   : > { %v760_v7 = vpack.c.bf16 (!%p167_p9), %v355_v4, %v354_v2  ;;  %v764_v8 = vpack.c.bf16 (!%p167_p9), %v357_v6, %v356_v5  ;;  %v358_v9 = vld [vmem:[%s1118_s2 + $0x20] sm:$0xff] (!%p167_p9)  ;;  %v359_v10 = vld [vmem:[%s1118_s2 + $0x28] sm:$0xff] (!%p167_p9)  ;;  %v360_v16 = vld [vmem:[%s1118_s2 + $0x30] sm:$0xff] (!%p167_p9)  ;;  %s189_s10 = sand.u32 (!%p167_p9), 1, %s901_s16   ;;  %vm553_vm3 = vcmask (!%p167_p9), 1043459   ;;  %vm556_vm4 = vcmask (!%p167_p9), 1044484  }
  0x10   : > { %757 = vmatprep.subr.bf16.mxu0 (!%p167_p9), %v756_v3  ;;  %v768_v14 = vpack.c.bf16 (!%p167_p9), %v359_v10, %v358_v9  ;;  %v361_v17 = vld [vmem:[%s1118_s2 + $0x38] sm:$0xff] (!%p167_p9)  ;;  %v362_v21 = vld [vmem:[%s1118_s2 + $0x40] sm:$0xff] (!%p167_p9)  ;;  %v363_v22 = vld [vmem:[%s1118_s2 + $0x48] sm:$0xff] (!%p167_p9)  ;;  %s646_s11 = sshll.u32 (!%p167_p9), %s189_s10, 3  ;;  %vm559_vm5 = vcmask (!%p167_p9), 1045509   ;;  %vm562_vm6 = vcmask (!%p167_p9), 1046534  }
  0x11   : > { %759 = vmatpush3.bf16.msra.mxu0 (!%p167_p9), %v756_v3  ;;  %792 = vmatprep.subr.bf16.mxu1 (!%p167_p9), %v760_v7  ;;  %v772_v19 = vpack.c.bf16 (!%p167_p9), %v361_v17, %v360_v16  ;;  %v776_v24 = vpack.c.bf16 (!%p167_p9), %v363_v22, %v362_v21  ;;  %v364_v25 = vld [vmem:[%s1118_s2 + $0x50] sm:$0xff] (!%p167_p9)  ;;  %v365_v26 = vld [vmem:[%s1118_s2 + $0x58] sm:$0xff] (!%p167_p9)  ;;  %v366_v29 = vld [vmem:[%s1118_s2 + $0x60] sm:$0xff] (!%p167_p9)  ;;  %s659_s12 = sshll.u32 (!%p167_p9), %s958_s19, 7  ;;  %s191_s13 = scalar_lea.vmem (!%p167_p9), [#allocation2], %s646_s11  ;;  %vm565_vm7 = vcmask (!%p167_p9), 1047559  }
  0x12   : > { %761 = vmatprep.subr.bf16.mxu0 (!%p167_p9), %v760_v7  ;;  %800 = vmatpush3.bf16.msra.mxu1 (!%p167_p9), %v760_v7  ;;  %v780_v28 = vpack.c.bf16 (!%p167_p9), %v365_v26, %v364_v25  ;;  %v367_v30 = vld [vmem:[%s1118_s2 + $0x68] sm:$0xff] (!%p167_p9)  ;;  %v368_v32 = vld [vmem:[%s1118_s2 + $0x70] sm:$0xff] (!%p167_p9)  ;;  %v369_v33 = vld [vmem:[%s1118_s2 + $0x78] sm:$0xff] (!%p167_p9)  ;;  %s1072_s27 = scalar_lea.hbm (!%p167_p9), %s1120_s4, %s659_s12  ;;  %s570_s19 = scalar_lea.sflag (!%p167_p9), [#allocation3], %s189_s10 }
  0x13   : > { %793 = vmatprep.subr.bf16.mxu1 (!%p167_p9), %v764_v8  ;;  %v784_v31 = vpack.c.bf16 (!%p167_p9), %v367_v30, %v366_v29  ;;  %v788_v34 = vpack.c.bf16 (!%p167_p9), %v369_v33, %v368_v32  ;;  %v657_v16 = vld [vmem:[%s1119_s3] ss:$0 sm:$0xff] (!%p167_p9)  ;;  %s911_s29 = smov (!%p167_p9), [#allocation2]  }
  0x14   : > { %s851_s30 = sshll.u32 (!%p167_p9), %s911_s29, 4  ;;  %s852_s30 = int_to_ptr.vmem [resolvable:$false] %s851_s30 }
  0x15   : > { %s1128_s5 = smov (!%p193_p10, %s647_s5), 15 }
  0x16   : > { %s648_s14 = sshll.u32 %s1128_s5, 3  ;;  %801 = vmatpush3.bf16.msra.mxu1 %v764_v8 }
  0x17   : > { %s1007_s23 = scalar_lea.vmem %s1116_s0, %s648_s14  ;;  %794 = vmatprep.subr.bf16.mxu1 %v768_v14  ;;  %s583_s14 = sshll.u32 %s191_s13, 4  ;;  %s1074_s14 = int_to_ptr.vmem [resolvable:$true] %s583_s14 }
  0x18   : > { %v198_v11 = vld [vmem:[%s1007_s23] sm:$0xff]  ;;  %v199_v12 = vld [vmem:[%s1007_s23 + $0x8] sm:$0xff]  ;;  %v200_v13 = vld [vmem:[%s1007_s23 + $0x10] sm:$0xff]  ;;  %s847_s28 = scalar_lea.vmem %s1074_s14, 128  ;;  %p854_p0 = scmp.lt.s32.totalorder %s1074_s14, %s852_s30 }
  0x19   : > { %700 = vmatprep.mubr.msk.f32.mxu0 %vm208_vm0, %v198_v11  ;;  %v201_v15 = vld [vmem:[%s1007_s23 + $0x18] sm:$0xff]  ;;  %v202_v18 = vld [vmem:[%s1007_s23 + $0x20] sm:$0xff]  ;;  %v203_v20 = vld [vmem:[%s1007_s23 + $0x28] sm:$0xff]  ;;  %p848_p11 = scmp.ne.s32.totalorder %s1074_s14, %s847_s28 }
  0x1a   : > { %701 = vmatmul.mubr.msk.f32.vlgmr.msra.gmra.mrb[0].mxu0 %vm208_vm0, %v199_v12  ;;  %802 = vmatpush3.bf16.msra.mxu1 %v768_v14  ;;  %v204_v23 = vld [vmem:[%s1007_s23 + $0x30] sm:$0xff]  ;;  %v205_v27 = vld [vmem:[%s1007_s23 + $0x38] sm:$0xff]  ;;  %s853_s23 = scalar_lea.vmem %s852_s30, 256 }
  0x1b   : > { %703 = vmatprep.mubr.msk.f32.mxu0 %vm208_vm0, %v200_v13  ;;  %763 = vmatpush3.bf16.msra.mxu0 %v760_v7  ;;  %p849_p12 = pnand %p848_p11, %p975_p5  ;;  %p855_p1 = scmp.lt.s32.totalorder %s853_s23, %s847_s28 }
  0x1c   : > { %765 = vmatprep.subr.bf16.mxu0 %v764_v8  ;;  %795 = vmatprep.subr.bf16.mxu1 %v772_v19 }
  0x1d   : > { %p850_p13 = pneg %p849_p12  ;;  %p856_p2 = por %p855_p1, %p854_p0 }
  0x1e   : > { %704 = vmatmul.mubr.msk.f32.gmra.mrb[2].mxu0 %vm208_vm0, %v201_v15  ;;  %803 = vmatpush3.bf16.msra.mxu1 %v772_v19 }
  0x1f   : > { %706 = vmatprep.mubr.msk.f32.mxu0 %vm208_vm0, %v202_v18  ;;  %767 = vmatpush3.bf16.msra.mxu0 %v764_v8  ;;  %p857_p3 = pnand %p856_p2, %p850_p13 }
  0x20   : > { %769 = vmatprep.subr.bf16.mxu0 %v768_v14  ;;  %796 = vmatprep.subr.bf16.mxu1 %v776_v24 }
  0x22   : > { %707 = vmatmul.mubr.msk.f32.gmra.mrb[4].mxu0 %vm208_vm0, %v203_v20  ;;  %804 = vmatpush3.bf16.msra.mxu1 %v776_v24 }
  0x23   : > { %709 = vmatprep.mubr.msk.f32.mxu0 %vm208_vm0, %v204_v23  ;;  %771 = vmatpush3.bf16.msra.mxu0 %v768_v14 }
  0x24   : > { %773 = vmatprep.subr.bf16.mxu0 %v772_v19  ;;  %797 = vmatprep.subr.bf16.mxu1 %v780_v28 }
  0x26   : > { %710 = vmatmul.mubr.msk.f32.gmra.mrb[6].mxu0 %vm208_vm0, %v205_v27  ;;  %805 = vmatpush3.bf16.msra.mxu1 %v780_v28 }
  0x27   : > { %775 = vmatpush3.bf16.msra.mxu0 %v772_v19  ;;  %798 = vmatprep.subr.bf16.mxu1 %v784_v31 }
  0x28   : > { %777 = vmatprep.subr.bf16.mxu0 %v776_v24 }
  0x2a   : > { %806 = vmatpush3.bf16.msra.mxu1 %v784_v31 }
  0x2b   : > { %779 = vmatpush3.bf16.msra.mxu0 %v776_v24  ;;  %799 = vmatprep.subr.bf16.mxu1 %v788_v34 }
  0x2c   : > { %781 = vmatprep.subr.bf16.mxu0 %v780_v28 }
  0x2e   : > { %807 = vmatpush3.bf16.msra.mxu1 %v788_v34 }
  0x2f   : > { %783 = vmatpush3.bf16.msra.mxu0 %v780_v28 }
  0x30   : > { %785 = vmatprep.subr.bf16.mxu0 %v784_v31 }
  0x33   : > { %787 = vmatpush3.bf16.msra.mxu0 %v784_v31 }
  0x34   : > { %789 = vmatprep.subr.bf16.mxu0 %v788_v34 }
  0x37   : > { %791 = vmatpush3.bf16.msra.mxu0 %v788_v34 }
  0xed   : > { %v702_v35 = vpop.f32.mrb[0].mxu0 }
  0xee   : > { %v339_v36 = vmul.f32 0.01, %v702_v35  ;;  %v299_v37 = vpop.f32.mrb[1].mxu0 }
  0xef   : > { %v338_v38 = vmul.f32 0.01, %v299_v37 }
  0xf0   : > { %v347_v41 = vmax.f32 %v702_v35, %v339_v36 }
  0xf1   : > { %v346_v39 = vmax.f32 %v299_v37, %v338_v38  ;;  %v705_v40 = vpop.f32.mrb[2].mxu0 }
  0xf2   : > { %v341_v42 = vmul.f32 0.01, %v705_v40  ;;  %v309_v43 = vpop.f32.mrb[3].mxu0 }
  0xf3   : > { %v340_v44 = vmul.f32 0.01, %v309_v43  ;;  %744 = vmatprep.mubr.f32.mxu0 %v346_v39 }
  0xf4   : > { %745 = vmatmul.mubr.f32.vlgmr.msra.gmra.mrb[8].mxu0 %v347_v41  ;;  %v349_v47 = vmax.f32 %v705_v40, %v341_v42 }
  0xf5   : > { %v708_v45 = vpop.f32.mrb[4].mxu0  ;;  %v348_v46 = vmax.f32 %v309_v43, %v340_v44 }
  0xf6   : > { %v343_v48 = vmul.f32 0.01, %v708_v45  ;;  %v319_v49 = vpop.f32.mrb[5].mxu0 }
  0xf7   : > { %v342_v50 = vmul.f32 0.01, %v319_v49  ;;  %747 = vmatprep.mubr.f32.mxu1 %v348_v46 }
  0xf8   : > { %748 = vmatmul.mubr.f32.vlgmr.msra.gmra.mrb[0].mxu1 %v349_v47  ;;  %v351_v53 = vmax.f32 %v708_v45, %v343_v48 }
  0xf9   : > { %v350_v51 = vmax.f32 %v319_v49, %v342_v50  ;;  %v711_v52 = vpop.f32.mrb[6].mxu0 }
  0xfa   : > { %v345_v54 = vmul.f32 0.01, %v711_v52  ;;  %v329_v55 = vpop.f32.mrb[7].mxu0 }
  0xfb   : > { %v344_v56 = vmul.f32 0.01, %v329_v55  ;;  %750 = vmatprep.mubr.f32.mxu1 %v350_v51 }
  0xfc   : > { %751 = vmatmul.mubr.f32.gmra.mrb[2].mxu1 %v351_v53  ;;  %v353_v58 = vmax.f32 %v711_v52, %v345_v54 }
  0xfd   : > { %v352_v57 = vmax.f32 %v329_v55, %v344_v56 }
  0xff   : > { %753 = vmatprep.mubr.f32.mxu1 %v352_v57 }
 0x100   : > { %754 = vmatmul.mubr.f32.gmra.mrb[4].mxu1 %v353_v58 }
 0x1c7   : > { %v746_v59 = vpop.f32.mrb[8].mxu0 }
 0x1c8   : > { %v481_v60 = vrot.slane %v746_v59, 4  ;;  %v436_v61 = vpop.f32.mrb[9].mxu0 }
 0x1c9   : > { %v475_v62 = vrot.slane %v436_v61, 4 }
 0x1ca   : > { %v482_v63 = vmax.f32 %v746_v59, %v481_v60 }
 0x1cb   : > { %v476_v0 = vmax.f32 %v436_v61, %v475_v62  ;;  %v749_v1 = vpop.f32.mrb[0].mxu1 }
 0x1cc   : > { %v483_v2 = vrot.slane %v482_v63, 2  ;;  %v493_v3 = vrot.slane %v749_v1, 4  ;;  %v446_v4 = vpop.f32.mrb[1].mxu1 }
 0x1cd   : > { %v477_v5 = vrot.slane %v476_v0, 2  ;;  %v487_v6 = vrot.slane %v446_v4, 4 }
 0x1ce   : > { %v484_v7 = vmax.f32 %v482_v63, %v483_v2  ;;  %v494_v8 = vmax.f32 %v749_v1, %v493_v3 }
 0x1cf   : > { %v478_v9 = vmax.f32 %v476_v0, %v477_v5  ;;  %v488_v10 = vmax.f32 %v446_v4, %v487_v6  ;;  %v752_v11 = vpop.f32.mrb[2].mxu1 }
 0x1d0   : > { %v485_v12 = vrot.slane %v484_v7, 1  ;;  %v495_v13 = vrot.slane %v494_v8, 2  ;;  %v505_v14 = vrot.slane %v752_v11, 4  ;;  %v456_v15 = vpop.f32.mrb[3].mxu1 }
 0x1d1   : > { %v479_v17 = vrot.slane %v478_v9, 1  ;;  %v489_v18 = vrot.slane %v488_v10, 2  ;;  %v499_v19 = vrot.slane %v456_v15, 4 }
 0x1d2   : > { %v486_v20 = vmax.f32 %v484_v7, %v485_v12  ;;  %v496_v21 = vmax.f32 %v494_v8, %v495_v13  ;;  %v506_v22 = vmax.f32 %v752_v11, %v505_v14 }
 0x1d3   : > { %v480_v23 = vmax.f32 %v478_v9, %v479_v17  ;;  %v490_v24 = vmax.f32 %v488_v10, %v489_v18  ;;  %v500_v25 = vmax.f32 %v456_v15, %v499_v19  ;;  %v755_v26 = vpop.f32.mrb[4].mxu1 }
 0x1d4   : > { %v531_v27 = vadd.f32 %v657_v16, %v486_v20  ;;  %v497_v28 = vrot.slane %v496_v21, 1  ;;  %v507_v29 = vrot.slane %v506_v22, 2  ;;  %v517_v30 = vrot.slane %v755_v26, 4  ;;  %v466_v31 = vpop.f32.mrb[5].mxu1 }
 0x1d5   : > { %v530_v32 = vadd.f32 %v657_v16, %v480_v23  ;;  %v491_v33 = vrot.slane %v490_v24, 1  ;;  %v501_v34 = vrot.slane %v500_v25, 2  ;;  %v511_v35 = vrot.slane %v466_v31, 4 }
 0x1d6   : > { %v546_v36 = vrot.slane %v531_v27, 7  ;;  %v498_v37 = vmax.f32 %v496_v21, %v497_v28  ;;  %v508_v38 = vmax.f32 %v506_v22, %v507_v29  ;;  %v518_v39 = vmax.f32 %v755_v26, %v517_v30 }
 0x1d7   : > { %v492_v40 = vmax.f32 %v490_v24, %v491_v33  ;;  %v502_v41 = vmax.f32 %v500_v25, %v501_v34  ;;  %v512_v42 = vmax.f32 %v466_v31, %v511_v35 }
 0x1d8   : > { %v548_v43 = vsel %vm547_vm1, %v546_v36, %v530_v32  ;;  %v533_v44 = vadd.f32 %v657_v16, %v498_v37  ;;  %v509_v45 = vrot.slane %v508_v38, 1  ;;  %v519_v46 = vrot.slane %v518_v39, 2 }
 0x1d9   : > { %v532_v47 = vadd.f32 %v657_v16, %v492_v40  ;;  %v503_v48 = vrot.slane %v502_v41, 1  ;;  %v513_v49 = vrot.slane %v512_v42, 2 }
 0x1da   : > { %v510_v50 = vmax.f32 %v508_v38, %v509_v45  ;;  %v520_v51 = vmax.f32 %v518_v39, %v519_v46  ;;  %v552_v55 = vrot.slane %v533_v44, 5 }
 0x1db   : > { %v549_v52 = vrot.slane %v532_v47, 6  ;;  %v504_v53 = vmax.f32 %v502_v41, %v503_v48  ;;  %v514_v54 = vmax.f32 %v512_v42, %v513_v49 }
 0x1dc   : > { %v535_v56 = vadd.f32 %v657_v16, %v510_v50  ;;  %v521_v57 = vrot.slane %v520_v51, 1 }
 0x1dd   : > { %v551_v58 = vsel %vm550_vm2, %v549_v52, %v548_v43  ;;  %v534_v59 = vadd.f32 %v657_v16, %v504_v53  ;;  %v515_v60 = vrot.slane %v514_v54, 1 }
 0x1de   : > { %v522_v61 = vmax.f32 %v520_v51, %v521_v57  ;;  %v554_v62 = vsel %vm553_vm3, %v552_v55, %v551_v58  ;;  %v558_v1 = vrot.slane %v535_v56, 3 }
 0x1df   : > { %v555_v63 = vrot.slane %v534_v59, 4  ;;  %v516_v0 = vmax.f32 %v514_v54, %v515_v60 }
 0x1e0   : > { %v537_v2 = vadd.f32 %v657_v16, %v522_v61 }
 0x1e1   : > { %v536_v3 = vadd.f32 %v657_v16, %v516_v0  ;;  %v557_v4 = vsel %vm556_vm4, %v555_v63, %v554_v62 }
 0x1e2   : > { %v560_v5 = vsel %vm559_vm5, %v558_v1, %v557_v4  ;;  %v564_v7 = vrot.slane %v537_v2, 1 }
 0x1e3   : > { %v561_v6 = vrot.slane %v536_v3, 2 }
 0x1e5   : > { %v563_v8 = vsel %vm562_vm6, %v561_v6, %v560_v5 }
 0x1e6   : > { %v566_v9 = vsel %vm565_vm7, %v564_v7, %v563_v8 }
 0x1e7   : > { %568 = vst [vmem:[%s191_s13] sm:$0xff] %v566_v9 }
 0x1e8   : > { %860 = shalt.err (!%p857_p3)
}
 0x1e9   : > { %s861_s5 = scalar_lea.hbm %s1072_s27, 128  ;;  %s865_s8 = scalar_lea.hbm %s1120_s4, 256 }
 0x1ea   : > { %p862_p4 = scmp.ne.s32.totalorder %s1072_s27, %s861_s5  ;;  %p866_p9 = scmp.lt.u32.totalorder %s1072_s27, %s1120_s4 }
 0x1eb   : > { %p867_p10 = scmp.lt.u32.totalorder %s865_s8, %s861_s5  ;;  %p869_p12 = scmp.lt.u32.totalorder %s861_s5, %s1072_s27 }
 0x1ec   : > { %p863_p7 = pnand %p862_p4, %p975_p5 }
 0x1ed   : > { %p868_p11 = por %p867_p10, %p866_p9 }
 0x1ee   : > { %p864_p8 = pneg %p863_p7 }
 0x1ef   : > { %p870_p13 = por %p869_p12, %p868_p11 }
 0x1f1   : > { %p871_p0 = pnand %p870_p13, %p864_p8 }
 0x1f3   : > { %874 = shalt.err (!%p871_p0)
}
 0x1f4   : > { %808 = dma.vmem_to_hbm [thread:$0]  (%p975_p5), %s1074_s14, 128, %s1072_s27, %s570_s19  }
 0x1f5 PF: > { %p814_p1 = scmp.ge.s32.totalorder %s909_s18, 2  ;;  %s595_s11 = sand.u32 1, %s897_s15  }
 0x1f6   : > { %s596_s12 = scalar_lea.sflag [#allocation3], %s595_s11 }
 0x1f7   : > { %p811_p2 = pnand %p814_p1, %p979_p6 }
 0x1f9   : > { %892 = dma.done.wait (!%p811_p2), %s596_s12, 128  }
 0x1fa   : > { %894 = vsyncadd (!%p811_p2), %s596_s12, 4294967168  ;;  %p14_p3 = scmp.ge.s32.totalorder %s962_s21, 4   ;;  %s1123_s15 = smov %s901_s16 }
 0x1fb   : > { %s1124_s16 = smov %s905_s17  ;;  %s1125_s17 = smov %s973_s24 }
 0x1fc   : > { %s1126_s18 = smov %s962_s21  ;;  %16 = sbr.rel (!%p14_p3) target bundleno = 3 (0x3), region = 71 }
 0x203   :  { %601 = vsyncpa [#allocation3], 1 }
 0x204   :  { %603 = vsyncpa [#allocation3 + $0x1], 1 }

</bundles_post_ra>
